<compile_context>
chip_gen: v5e
topology: v5e:2x2
jax: 0.10.0
libtpu: 0.0.40
codegen_flags: <defaults>
</compile_context>

<pallas_src>
import functools

import jax
import jax.numpy as jnp
from jax.experimental import pallas as pl
from jax.experimental.pallas import tpu as pltpu

_LANE = 128     # feature dims padded to multiples of the 128-wide lane axis
_SUBLANE = 16   # batch padded to bf16-friendly sublane multiples (also satisfies (8,128))


def _round_up(n, m):
    return ((n + m - 1) // m) * m


def _fused_mlp_kernel(x_ref, *refs, num_layers):
    """One batch tile through the whole MLP; activations never leave VMEM/vregs."""
    o_ref = refs[-1]
    h = x_ref[...].astype(jnp.bfloat16)              # bf16 feed for the MXU
    for i in range(num_layers):
        w = refs[2 * i][...]                         # (Din_pad, Dout_pad)  bf16
        b = refs[2 * i + 1][...]                     # (1, Dout_pad)        f32
        # MXU matmul, f32 accumulation; bias (+ReLU) epilogue on the VPU in f32.
        acc = jnp.dot(h, w, preferred_element_type=jnp.float32) + b
        if i < num_layers - 1:                       # no activation after final Linear
            h = jnp.maximum(acc, 0.0).astype(jnp.bfloat16)   # back to bf16 for next dot
        else:
            h = acc
    o_ref[...] = h.astype(o_ref.dtype)


def init_mlp_params(key, input_dim, hidden_dims, output_dim, dtype=jnp.float32):
    """Mirror nn.Linear default init (uniform +/- 1/sqrt(fan_in)); W stored [in, out]."""
    dims = [input_dim] + hidden_dims + [output_dim]
    params = []
    for i in range(1, len(dims)):
        fan_in, fan_out = dims[i - 1], dims[i]
        key, kw, kb = jax.random.split(key, 3)
        bound = 1.0 / (fan_in ** 0.5)
        w = jax.random.uniform(kw, (fan_in, fan_out), dtype, -bound, bound)
        b = jax.random.uniform(kb, (1, fan_out), dtype, -bound, bound)
        params.append((w, b))
    return params


def pad_mlp_params(params, input_dim, weight_dtype=jnp.bfloat16):
    """One-time lane-dense padding + bf16 cast, hoisted out of the forward path.

    Zero pads are exact for Linear+ReLU.  Weights go to bf16 (MXU-native on all
    generations, halves weight HBM/VMEM bytes); biases stay f32 for the f32 epilogue.
    """
    dims = [input_dim] + [w.shape[1] for (w, _) in params]
    pdims = [_round_up(d, _LANE) for d in dims]
    padded = []
    for li, (w, b) in enumerate(params):
        w_p = (jnp.zeros((pdims[li], pdims[li + 1]), weight_dtype)
               .at[: w.shape[0], : w.shape[1]].set(w.astype(weight_dtype)))
        b_p = (jnp.zeros((1, pdims[li + 1]), jnp.float32)
               .at[:, : b.shape[1]].set(b.astype(jnp.float32)))
        padded.append((w_p, b_p))
    return padded, dims


def mlp_forward(padded_params, dims, x, *, single_buffer_weights=True):
    """Fused forward pass: ReLU after every layer except the last (activation='relu')."""
    B, Din = x.shape
    assert Din == dims[0]
    num_layers = len(padded_params)
    pdims = [padded_params[0][0].shape[0]] + [w.shape[1] for (w, _) in padded_params]

    n_wbuf = 1 if single_buffer_weights else 2
    weight_bytes = sum(w.size * w.dtype.itemsize + b.size * b.dtype.itemsize
                       for (w, b) in padded_params)

    def _act_bytes(t):
        # double-buffered in/out batch tiles (f32) + f32 activation strip / spill headroom
        return 2 * t * (pdims[0] + pdims[-1]) * 4 + 4 * t * max(pdims) * 4

    # --- batch tile selection -------------------------------------------------
    b_min = _round_up(B, _SUBLANE)
    if b_min <= 2 * _SUBLANE:
        tb = b_min                                      # tiny batch: single tile
    elif b_min <= 1024:
        tb = _round_up(pl.cdiv(b_min, 2), _SUBLANE)     # >=2 grid steps -> both v7x TCs busy
    else:
        tb = 512                                        # big tiles amortize per-step overhead
    while tb > _SUBLANE and weight_bytes * n_wbuf + _act_bytes(tb) > (48 << 20):
        tb = _round_up(tb // 2, _SUBLANE)               # shrink until resident set fits
    b_pad = _round_up(B, tb)

    # --- explicit VMEM budget (capped below v7x's 64 MiB physical) -------------
    vmem_needed = weight_bytes * n_wbuf + _act_bytes(tb)
    vmem_limit = int(min(max(1.5 * vmem_needed + (2 << 20), 32 << 20), 56 << 20))

    # --- pad input batch (only per-call padding left; weights were pre-padded) -
    x_p = jnp.zeros((b_pad, pdims[0]), x.dtype).at[:B, :Din].set(x)

    def _wb_spec(shape):
        # Same block index every grid step -> weights stay resident in VMEM.
        if single_buffer_weights:
            return pl.BlockSpec(shape, lambda i: (0, 0), pipeline_mode=pl.Buffered(1))
        return pl.BlockSpec(shape, lambda i: (0, 0))

    in_specs = [pl.BlockSpec((tb, pdims[0]), lambda i: (i, 0))]
    flat_wb = []
    for (w_p, b_p) in padded_params:
        flat_wb += [w_p, b_p]
        in_specs.append(_wb_spec(w_p.shape))
        in_specs.append(_wb_spec(b_p.shape))
    out_specs = pl.BlockSpec((tb, pdims[-1]), lambda i: (i, 0))

    flops = sum(2 * B * dims[i] * dims[i + 1] for i in range(num_layers))
    bytes_accessed = (x_p.size * x_p.dtype.itemsize
                      + weight_bytes
                      + b_pad * pdims[-1] * x.dtype.itemsize)

    kernel = functools.partial(_fused_mlp_kernel, num_layers=num_layers)
    y_p = pl.pallas_call(
        kernel,
        out_shape=jax.ShapeDtypeStruct((b_pad, pdims[-1]), x.dtype),
        grid=(b_pad // tb,),
        in_specs=in_specs,
        out_specs=out_specs,
        compiler_params=pltpu.CompilerParams(
            dimension_semantics=("parallel",),
            vmem_limit_bytes=vmem_limit,
        ),
        cost_estimate=pl.CostEstimate(
            flops=flops, transcendentals=0, bytes_accessed=bytes_accessed
        ),
    )(x_p, *flat_wb)

    return y_p[:B, : dims[-1]]


def mlp_apply(padded_params, dims, x):
    """Forward with single-buffered weight blocks; falls back if Buffered(1) is rejected."""
    try:
        y = mlp_forward(padded_params, dims, x, single_buffer_weights=True)
        return jax.block_until_ready(y)
    except Exception:
        # TODO(synk): this JAX build rejected pl.Buffered(1); default double-buffered
        # weight blocks cost 2x weight VMEM but are otherwise identical.
        y = mlp_forward(padded_params, dims, x, single_buffer_weights=False)
        return jax.block_until_ready(y)


if __name__ == "__main__":
    key = jax.random.PRNGKey(0)
    kx, kp = jax.random.split(key)

    batch = 8
    input_dim = 16
    hidden_dims = [32, 32]
    output_dim = 8

    x = jax.random.normal(kx, (batch, input_dim), dtype=jnp.float32)
    params = init_mlp_params(kp, input_dim, hidden_dims, output_dim)
    padded_params, dims = pad_mlp_params(params, input_dim)   # one-time, out of hot path

    y = mlp_apply(padded_params, dims, x)
    jax.block_until_ready(y)

    # sanity check against plain-JAX f32 reference (bf16 MXU feed -> looser tolerance)
    ref = x
    for i, (w, b) in enumerate(params):
        ref = ref @ w + b
        if i < len(params) - 1:
            ref = jnp.maximum(ref, 0.0)
    assert y.shape == (batch, output_dim)
    assert jnp.allclose(y, ref, atol=5e-2, rtol=5e-2), float(jnp.max(jnp.abs(y - ref)))

    print("KERNEL_OK")
</pallas_src>

<mosaic_0001>
module attributes {stable_mosaic.version = 11 : i64} {
  func.func @_fused_mlp_kernel(%arg0: i32, %arg1: memref<16x128xf32, #tpu.memory_space<vmem>>, %arg2: memref<128x128xbf16, #tpu.memory_space<vmem>>, %arg3: memref<1x128xf32, #tpu.memory_space<vmem>>, %arg4: memref<128x128xbf16, #tpu.memory_space<vmem>>, %arg5: memref<1x128xf32, #tpu.memory_space<vmem>>, %arg6: memref<128x128xbf16, #tpu.memory_space<vmem>>, %arg7: memref<1x128xf32, #tpu.memory_space<vmem>>, %arg8: memref<16x128xf32, #tpu.memory_space<vmem>>) attributes {dimension_semantics = [#tpu.dimension_semantics<parallel>], iteration_bounds = array<i64: 1>, scalar_prefetch = 0 : i64, scratch_operands = 0 : i64, tpu.core_type = #tpu.core_type<tc>, window_params = [{transform_indices = @transform_0, window_bounds = array<i64: 16, 128>}, {pipeline_mode = #tpu.pipeline_mode<synchronous>, transform_indices = @transform_1, window_bounds = array<i64: 128, 128>}, {pipeline_mode = #tpu.pipeline_mode<synchronous>, transform_indices = @transform_2, window_bounds = array<i64: 1, 128>}, {pipeline_mode = #tpu.pipeline_mode<synchronous>, transform_indices = @transform_3, window_bounds = array<i64: 128, 128>}, {pipeline_mode = #tpu.pipeline_mode<synchronous>, transform_indices = @transform_4, window_bounds = array<i64: 1, 128>}, {pipeline_mode = #tpu.pipeline_mode<synchronous>, transform_indices = @transform_5, window_bounds = array<i64: 128, 128>}, {pipeline_mode = #tpu.pipeline_mode<synchronous>, transform_indices = @transform_6, window_bounds = array<i64: 1, 128>}, {transform_indices = @transform_7, window_bounds = array<i64: 16, 128>}]} {
    %c0 = arith.constant 0 : index
    %c0_0 = arith.constant 0 : index
    %0 = vector.load %arg1[%c0, %c0_0] : memref<16x128xf32, #tpu.memory_space<vmem>>, vector<16x128xf32>
    %1 = arith.truncf %0 : vector<16x128xf32> to vector<16x128xbf16>
    %c0_1 = arith.constant 0 : index
    %c0_2 = arith.constant 0 : index
    %2 = vector.load %arg2[%c0_1, %c0_2] : memref<128x128xbf16, #tpu.memory_space<vmem>>, vector<128x128xbf16>
    %c0_3 = arith.constant 0 : index
    %c0_4 = arith.constant 0 : index
    %3 = vector.load %arg3[%c0_3, %c0_4] : memref<1x128xf32, #tpu.memory_space<vmem>>, vector<1x128xf32>
    %cst = arith.constant dense<0.000000e+00> : vector<16x128xf32>
    %4 = tpu.matmul %1, %2, %cst {dimension_numbers = #tpu.dot_dimension_numbers<[1], [0], [0], [1], [0, 0, 1, 1], [], []>} : vector<16x128xbf16>, vector<128x128xbf16>, vector<16x128xf32> -> vector<16x128xf32>
    %5 = vector.broadcast %3 : vector<1x128xf32> to vector<16x128xf32>
    %6 = arith.addf %4, %5 : vector<16x128xf32>
    %cst_5 = arith.constant 0.000000e+00 : f32
    %7 = vector.broadcast %cst_5 : f32 to vector<16x128xf32>
    %8 = arith.maximumf %6, %7 : vector<16x128xf32>
    %9 = arith.truncf %8 : vector<16x128xf32> to vector<16x128xbf16>
    %c0_6 = arith.constant 0 : index
    %c0_7 = arith.constant 0 : index
    %10 = vector.load %arg4[%c0_6, %c0_7] : memref<128x128xbf16, #tpu.memory_space<vmem>>, vector<128x128xbf16>
    %c0_8 = arith.constant 0 : index
    %c0_9 = arith.constant 0 : index
    %11 = vector.load %arg5[%c0_8, %c0_9] : memref<1x128xf32, #tpu.memory_space<vmem>>, vector<1x128xf32>
    %cst_10 = arith.constant dense<0.000000e+00> : vector<16x128xf32>
    %12 = tpu.matmul %9, %10, %cst_10 {dimension_numbers = #tpu.dot_dimension_numbers<[1], [0], [0], [1], [0, 0, 1, 1], [], []>} : vector<16x128xbf16>, vector<128x128xbf16>, vector<16x128xf32> -> vector<16x128xf32>
    %13 = vector.broadcast %11 : vector<1x128xf32> to vector<16x128xf32>
    %14 = arith.addf %12, %13 : vector<16x128xf32>
    %cst_11 = arith.constant 0.000000e+00 : f32
    %15 = vector.broadcast %cst_11 : f32 to vector<16x128xf32>
    %16 = arith.maximumf %14, %15 : vector<16x128xf32>
    %17 = arith.truncf %16 : vector<16x128xf32> to vector<16x128xbf16>
    %c0_12 = arith.constant 0 : index
    %c0_13 = arith.constant 0 : index
    %18 = vector.load %arg6[%c0_12, %c0_13] : memref<128x128xbf16, #tpu.memory_space<vmem>>, vector<128x128xbf16>
    %c0_14 = arith.constant 0 : index
    %c0_15 = arith.constant 0 : index
    %19 = vector.load %arg7[%c0_14, %c0_15] : memref<1x128xf32, #tpu.memory_space<vmem>>, vector<1x128xf32>
    %cst_16 = arith.constant dense<0.000000e+00> : vector<16x128xf32>
    %20 = tpu.matmul %17, %18, %cst_16 {dimension_numbers = #tpu.dot_dimension_numbers<[1], [0], [0], [1], [0, 0, 1, 1], [], []>} : vector<16x128xbf16>, vector<128x128xbf16>, vector<16x128xf32> -> vector<16x128xf32>
    %21 = vector.broadcast %19 : vector<1x128xf32> to vector<16x128xf32>
    %22 = arith.addf %20, %21 : vector<16x128xf32>
    %c0_17 = arith.constant 0 : index
    %c0_18 = arith.constant 0 : index
    %23 = vector.load %arg8[%c0_17, %c0_18] : memref<16x128xf32, #tpu.memory_space<vmem>>, vector<16x128xf32>
    tpu.vector_store %arg8[%c0_17, %c0_18], %22 {strides = array<i32>} : memref<16x128xf32, #tpu.memory_space<vmem>>, vector<16x128xf32>,
    return
  }
  func.func @transform_0(%arg0: i32) -> (i32, i32) {
    %c0_i32 = arith.constant 0 : i32
    %c0_i32_0 = arith.constant 0 : i32
    return %arg0, %c0_i32 : i32, i32
  }
  func.func @transform_1(%arg0: i32) -> (i32, i32) {
    %c0_i32 = arith.constant 0 : i32
    %c0_i32_0 = arith.constant 0 : i32
    %c0_i32_1 = arith.constant 0 : i32
    return %c0_i32, %c0_i32_0 : i32, i32
  }
  func.func @transform_2(%arg0: i32) -> (i32, i32) {
    %c0_i32 = arith.constant 0 : i32
    %c0_i32_0 = arith.constant 0 : i32
    %c0_i32_1 = arith.constant 0 : i32
    return %c0_i32, %c0_i32_0 : i32, i32
  }
  func.func @transform_3(%arg0: i32) -> (i32, i32) {
    %c0_i32 = arith.constant 0 : i32
    %c0_i32_0 = arith.constant 0 : i32
    %c0_i32_1 = arith.constant 0 : i32
    return %c0_i32, %c0_i32_0 : i32, i32
  }
  func.func @transform_4(%arg0: i32) -> (i32, i32) {
    %c0_i32 = arith.constant 0 : i32
    %c0_i32_0 = arith.constant 0 : i32
    %c0_i32_1 = arith.constant 0 : i32
    return %c0_i32, %c0_i32_0 : i32, i32
  }
  func.func @transform_5(%arg0: i32) -> (i32, i32) {
    %c0_i32 = arith.constant 0 : i32
    %c0_i32_0 = arith.constant 0 : i32
    %c0_i32_1 = arith.constant 0 : i32
    return %c0_i32, %c0_i32_0 : i32, i32
  }
  func.func @transform_6(%arg0: i32) -> (i32, i32) {
    %c0_i32 = arith.constant 0 : i32
    %c0_i32_0 = arith.constant 0 : i32
    %c0_i32_1 = arith.constant 0 : i32
    return %c0_i32, %c0_i32_0 : i32, i32
  }
  func.func @transform_7(%arg0: i32) -> (i32, i32) {
    %c0_i32 = arith.constant 0 : i32
    %c0_i32_0 = arith.constant 0 : i32
    return %arg0, %c0_i32 : i32, i32
  }
}

module attributes {stable_mosaic.version = 11 : i64} {
  func.func @_fused_mlp_kernel(%arg0: i32, %arg1: memref<16x128xf32, #tpu.memory_space<vmem>>, %arg2: memref<128x128xbf16, #tpu.memory_space<vmem>>, %arg3: memref<1x128xf32, #tpu.memory_space<vmem>>, %arg4: memref<128x128xbf16, #tpu.memory_space<vmem>>, %arg5: memref<1x128xf32, #tpu.memory_space<vmem>>, %arg6: memref<128x128xbf16, #tpu.memory_space<vmem>>, %arg7: memref<1x128xf32, #tpu.memory_space<vmem>>, %arg8: memref<16x128xf32, #tpu.memory_space<vmem>>) attributes {dimension_semantics = [#tpu.dimension_semantics<parallel>], iteration_bounds = array<i64: 1>, scalar_prefetch = 0 : i64, scratch_operands = 0 : i64, tpu.core_type = #tpu.core_type<tc>, window_params = [{transform_indices = @transform_0, window_bounds = array<i64: 16, 128>}, {pipeline_mode = #tpu.pipeline_mode<synchronous>, transform_indices = @transform_1, window_bounds = array<i64: 128, 128>}, {pipeline_mode = #tpu.pipeline_mode<synchronous>, transform_indices = @transform_2, window_bounds = array<i64: 1, 128>}, {pipeline_mode = #tpu.pipeline_mode<synchronous>, transform_indices = @transform_3, window_bounds = array<i64: 128, 128>}, {pipeline_mode = #tpu.pipeline_mode<synchronous>, transform_indices = @transform_4, window_bounds = array<i64: 1, 128>}, {pipeline_mode = #tpu.pipeline_mode<synchronous>, transform_indices = @transform_5, window_bounds = array<i64: 128, 128>}, {pipeline_mode = #tpu.pipeline_mode<synchronous>, transform_indices = @transform_6, window_bounds = array<i64: 1, 128>}, {transform_indices = @transform_7, window_bounds = array<i64: 16, 128>}]} {
    %c0 = arith.constant 0 : index
    %c0_0 = arith.constant 0 : index
    %0 = vector.load %arg1[%c0, %c0_0] : memref<16x128xf32, #tpu.memory_space<vmem>>, vector<16x128xf32>
    %1 = arith.truncf %0 : vector<16x128xf32> to vector<16x128xbf16>
    %c0_1 = arith.constant 0 : index
    %c0_2 = arith.constant 0 : index
    %2 = vector.load %arg2[%c0_1, %c0_2] : memref<128x128xbf16, #tpu.memory_space<vmem>>, vector<128x128xbf16>
    %c0_3 = arith.constant 0 : index
    %c0_4 = arith.constant 0 : index
    %3 = vector.load %arg3[%c0_3, %c0_4] : memref<1x128xf32, #tpu.memory_space<vmem>>, vector<1x128xf32>
    %cst = arith.constant dense<0.000000e+00> : vector<16x128xf32>
    %4 = tpu.matmul %1, %2, %cst {dimension_numbers = #tpu.dot_dimension_numbers<[1], [0], [0], [1], [0, 0, 1, 1], [], []>} : vector<16x128xbf16>, vector<128x128xbf16>, vector<16x128xf32> -> vector<16x128xf32>
    %5 = vector.broadcast %3 : vector<1x128xf32> to vector<16x128xf32>
    %6 = arith.addf %4, %5 : vector<16x128xf32>
    %cst_5 = arith.constant 0.000000e+00 : f32
    %7 = vector.broadcast %cst_5 : f32 to vector<16x128xf32>
    %8 = arith.maximumf %6, %7 : vector<16x128xf32>
    %9 = arith.truncf %8 : vector<16x128xf32> to vector<16x128xbf16>
    %c0_6 = arith.constant 0 : index
    %c0_7 = arith.constant 0 : index
    %10 = vector.load %arg4[%c0_6, %c0_7] : memref<128x128xbf16, #tpu.memory_space<vmem>>, vector<128x128xbf16>
    %c0_8 = arith.constant 0 : index
    %c0_9 = arith.constant 0 : index
    %11 = vector.load %arg5[%c0_8, %c0_9] : memref<1x128xf32, #tpu.memory_space<vmem>>, vector<1x128xf32>
    %cst_10 = arith.constant dense<0.000000e+00> : vector<16x128xf32>
    %12 = tpu.matmul %9, %10, %cst_10 {dimension_numbers = #tpu.dot_dimension_numbers<[1], [0], [0], [1], [0, 0, 1, 1], [], []>} : vector<16x128xbf16>, vector<128x128xbf16>, vector<16x128xf32> -> vector<16x128xf32>
    %13 = vector.broadcast %11 : vector<1x128xf32> to vector<16x128xf32>
    %14 = arith.addf %12, %13 : vector<16x128xf32>
    %cst_11 = arith.constant 0.000000e+00 : f32
    %15 = vector.broadcast %cst_11 : f32 to vector<16x128xf32>
    %16 = arith.maximumf %14, %15 : vector<16x128xf32>
    %17 = arith.truncf %16 : vector<16x128xf32> to vector<16x128xbf16>
    %c0_12 = arith.constant 0 : index
    %c0_13 = arith.constant 0 : index
    %18 = vector.load %arg6[%c0_12, %c0_13] : memref<128x128xbf16, #tpu.memory_space<vmem>>, vector<128x128xbf16>
    %c0_14 = arith.constant 0 : index
    %c0_15 = arith.constant 0 : index
    %19 = vector.load %arg7[%c0_14, %c0_15] : memref<1x128xf32, #tpu.memory_space<vmem>>, vector<1x128xf32>
    %cst_16 = arith.constant dense<0.000000e+00> : vector<16x128xf32>
    %20 = tpu.matmul %17, %18, %cst_16 {dimension_numbers = #tpu.dot_dimension_numbers<[1], [0], [0], [1], [0, 0, 1, 1], [], []>} : vector<16x128xbf16>, vector<128x128xbf16>, vector<16x128xf32> -> vector<16x128xf32>
    %21 = vector.broadcast %19 : vector<1x128xf32> to vector<16x128xf32>
    %22 = arith.addf %20, %21 : vector<16x128xf32>
    %c0_17 = arith.constant 0 : index
    %c0_18 = arith.constant 0 : index
    %23 = vector.load %arg8[%c0_17, %c0_18] : memref<16x128xf32, #tpu.memory_space<vmem>>, vector<16x128xf32>
    tpu.vector_store %arg8[%c0_17, %c0_18], %22 {strides = array<i32>} : memref<16x128xf32, #tpu.memory_space<vmem>>, vector<16x128xf32>,
    return
  }
  func.func @transform_0(%arg0: i32) -> (i32, i32) {
    %c0_i32 = arith.constant 0 : i32
    %c0_i32_0 = arith.constant 0 : i32
    return %arg0, %c0_i32 : i32, i32
  }
  func.func @transform_1(%arg0: i32) -> (i32, i32) {
    %c0_i32 = arith.constant 0 : i32
    %c0_i32_0 = arith.constant 0 : i32
    %c0_i32_1 = arith.constant 0 : i32
    return %c0_i32, %c0_i32_0 : i32, i32
  }
  func.func @transform_2(%arg0: i32) -> (i32, i32) {
    %c0_i32 = arith.constant 0 : i32
    %c0_i32_0 = arith.constant 0 : i32
    %c0_i32_1 = arith.constant 0 : i32
    return %c0_i32, %c0_i32_0 : i32, i32
  }
  func.func @transform_3(%arg0: i32) -> (i32, i32) {
    %c0_i32 = arith.constant 0 : i32
    %c0_i32_0 = arith.constant 0 : i32
    %c0_i32_1 = arith.constant 0 : i32
    return %c0_i32, %c0_i32_0 : i32, i32
  }
  func.func @transform_4(%arg0: i32) -> (i32, i32) {
    %c0_i32 = arith.constant 0 : i32
    %c0_i32_0 = arith.constant 0 : i32
    %c0_i32_1 = arith.constant 0 : i32
    return %c0_i32, %c0_i32_0 : i32, i32
  }
  func.func @transform_5(%arg0: i32) -> (i32, i32) {
    %c0_i32 = arith.constant 0 : i32
    %c0_i32_0 = arith.constant 0 : i32
    %c0_i32_1 = arith.constant 0 : i32
    return %c0_i32, %c0_i32_0 : i32, i32
  }
  func.func @transform_6(%arg0: i32) -> (i32, i32) {
    %c0_i32 = arith.constant 0 : i32
    %c0_i32_0 = arith.constant 0 : i32
    %c0_i32_1 = arith.constant 0 : i32
    return %c0_i32, %c0_i32_0 : i32, i32
  }
  func.func @transform_7(%arg0: i32) -> (i32, i32) {
    %c0_i32 = arith.constant 0 : i32
    %c0_i32_0 = arith.constant 0 : i32
    return %arg0, %c0_i32 : i32, i32
  }
}

</mosaic_0001>

<bundles_post_ra>
// kernel: tpu_custom_call.1
= control target key start
LH: loop header
LB: loop body
LE: loop exit
PB: predicated region body
PF: predicated region fallthrough
CT: control target
= control target key end

     0   :  { %12 = vsyncpa [#allocation3], 0  ;;  %s707_s0 = inlined_call_operand.hbm [shape: f32[16,128], index: 0, kind: input, shape index: {}]   ;;  %s708_s1 = inlined_call_operand.hbm [shape: bf16[128,128], index: 1, kind: input, shape index: {}]   ;;  %s709_s2 = inlined_call_operand.vmem [shape: f32[1,128], index: 2, kind: input, shape index: {}]   ;;  %s710_s3 = inlined_call_operand.hbm [shape: bf16[128,128], index: 3, kind: input, shape index: {}]   ;;  %s711_s4 = inlined_call_operand.vmem [shape: f32[1,128], index: 4, kind: input, shape index: {}]   ;;  %s712_s5 = inlined_call_operand.hbm [shape: bf16[128,128], index: 5, kind: input, shape index: {}]   ;;  %s713_s6 = inlined_call_operand.vmem [shape: f32[1,128], index: 6, kind: input, shape index: {}]   ;;  %s714_s7 = inlined_call_operand.hbm [shape: f32[16,128], index: 7, kind: output, shape index: {}]  }
   0x1   :  { %13 = vsyncpa [#allocation6], 0 }
   0x2   :  { %14 = vsyncpa [#allocation9], 0  ;;  %s33_s26 = sshll.u32 %s708_s1, 4  ;;  %s34_s26 = int_to_ptr.hbm [resolvable:$true] %s33_s26 }
   0x3   :  { %15 = vsyncpa [#allocation4], 0  ;;  %s628_s27 = smov [#allocation5]   ;;  %s20_s8 = sshll.u32 %s707_s0, 4  ;;  %s21_s8 = int_to_ptr.hbm [resolvable:$true] %s20_s8 }
   0x4   :  { %s35_s28 = sshll.u32 %s628_s27, 4  ;;  %s629_s9 = smov 64   ;;  %s36_s28 = int_to_ptr.vmem [resolvable:$true] %s35_s28 }
   0x5   :  { %s630_s10 = smov 4   ;;  %s631_s11 = smov [#allocation2]  }
   0x6   :  { %41 = dma.hbm_to_vmem [thread:$0]  %s34_s26, 1024, %s36_s28, [#allocation6], %s629_s9, %s629_s9, %s630_s10  }
   0x7   :  { %s22_s12 = sshll.u32 %s631_s11, 4  ;;  %s632_s13 = smov 128   ;;  %s23_s12 = int_to_ptr.vmem [resolvable:$true] %s22_s12 }
   0x8   :  { %s633_s14 = smov 8   ;;  %s48_s16 = sshll.u32 %s710_s3, 4  ;;  %s49_s16 = int_to_ptr.hbm [resolvable:$true] %s48_s16 }
   0x9   :  { %28 = dma.hbm_to_vmem [thread:$0]  %s21_s8, 256, %s23_s12, [#allocation3], %s632_s13, %s632_s13, %s633_s14  }
   0xa   :  { %s634_s17 = smov [#allocation7]   ;;  %s63_s20 = sshll.u32 %s712_s5, 4  ;;  %s64_s20 = int_to_ptr.hbm [resolvable:$true] %s63_s20 }
   0xb   :  { %s50_s0 = sshll.u32 %s634_s17, 4  ;;  %s635_s21 = smov [#allocation8]   ;;  %s51_s0 = int_to_ptr.vmem [resolvable:$true] %s50_s0 }
   0xc   :  { %56 = dma.hbm_to_vmem [thread:$0]  %s49_s16, 1024, %s51_s0, [#allocation6], %s629_s9, %s629_s9, %s630_s10  }
   0xd   :  { %s65_s22 = sshll.u32 %s635_s21, 4  ;;  %s66_s22 = int_to_ptr.vmem [resolvable:$true] %s65_s22 }
   0xe   :  { %71 = dma.hbm_to_vmem [thread:$0]  %s64_s20, 1024, %s66_s22, [#allocation9], %s629_s9, %s629_s9, %s630_s10  }
   0xf   :  { %620 = dma.done.wait [#allocation3], 256  }
  0x10   :  { %621 = vsyncadd [#allocation3], 4294967040 }
  0x11   :  { %622 = dma.done.wait [#allocation6], 2048  }
  0x12   :  { %623 = vsyncadd [#allocation6], 4294965248 }
  0x13   :  { %624 = dma.done.wait [#allocation9], 1024  }
  0x14   :  { %625 = vsyncadd [#allocation9], 4294966272  ;;  %v471_v0 = vld [vmem:[#allocation5 + $0x38] sm:$0xff]  ;;  %v470_v1 = vld [vmem:[#allocation5 + $0x30] sm:$0xff]  ;;  %s636_s26 = smov [#allocation10]  }
  0x15   :  { %161 = vmatpush.bf16.msra.mxu0 %v471_v0  ;;  %v479_v2 = vld [vmem:[#allocation7 + $0x38] sm:$0xff]  ;;  %v478_v3 = vld [vmem:[#allocation7 + $0x30] sm:$0xff]  ;;  %v469_v4 = vld [vmem:[#allocation5 + $0x28] sm:$0xff]  ;;  %s351_s27 = sshll.u32 %s636_s26, 4  ;;  %s352_s27 = int_to_ptr.vmem [resolvable:$true] %s351_s27 }
  0x16   :  { %246 = vmatpush.bf16.msra.mxu1 %v479_v2  ;;  %v477_v5 = vld [vmem:[#allocation7 + $0x28] sm:$0xff]  ;;  %v468_v6 = vld [vmem:[#allocation5 + $0x20] sm:$0xff]  ;;  %v467_v8 = vld [vmem:[#allocation5 + $0x18] sm:$0xff] }
  0x17   :  { %v476_v7 = vld [vmem:[#allocation7 + $0x20] sm:$0xff]  ;;  %v466_v9 = vld [vmem:[#allocation5 + $0x10] sm:$0xff]  ;;  %v465_v10 = vld [vmem:[#allocation5 + $0x8] sm:$0xff] }
  0x18   :  { %v464_v11 = vld [vmem:[#allocation5] sm:$0xff]  ;;  %v90_v12 = vld [vmem:[#allocation2] sm:$0xff]  ;;  %v91_v13 = vld [vmem:[#allocation2 + $0x8] sm:$0xff] }
  0x19   :  { %162 = vmatpush.bf16.msra.mxu0 %v470_v1  ;;  %v92_v14 = vpack.c.bf16 %v91_v13, %v90_v12  ;;  %v475_v15 = vld [vmem:[#allocation7 + $0x18] sm:$0xff]  ;;  %v474_v16 = vld [vmem:[#allocation7 + $0x10] sm:$0xff]  ;;  %v473_v17 = vld [vmem:[#allocation7 + $0x8] sm:$0xff] }
  0x1a   :  { %247 = vmatpush.bf16.msra.mxu1 %v478_v3  ;;  %v472_v18 = vld [vmem:[#allocation7] sm:$0xff]  ;;  %v487_v19 = vld [vmem:[#allocation8 + $0x38] sm:$0xff]  ;;  %v486_v20 = vld [vmem:[#allocation8 + $0x30] sm:$0xff] }
  0x1b   :  { %331 = vmatpush.bf16.msra.mxu2 %v487_v19  ;;  %v485_v21 = vld [vmem:[#allocation8 + $0x28] sm:$0xff]  ;;  %v484_v22 = vld [vmem:[#allocation8 + $0x20] sm:$0xff]  ;;  %v497_v24 = vld [vmem:[%s709_s2] ss:$0 sm:$0xff] }
  0x1c   :  { %v483_v31 = vld [vmem:[#allocation8 + $0x18] sm:$0xff]  ;;  %v482_v32 = vld [vmem:[#allocation8 + $0x10] sm:$0xff]  ;;  %v481_v33 = vld [vmem:[#allocation8 + $0x8] sm:$0xff] }
  0x1d   :  { %163 = vmatpush.bf16.msra.mxu0 %v469_v4  ;;  %v480_v34 = vld [vmem:[#allocation8] sm:$0xff]  ;;  %v498_v36 = vld [vmem:[%s711_s4] ss:$0 sm:$0xff]  ;;  %s353_s4 = sshll.u32 %s714_s7, 4  ;;  %s354_s4 = int_to_ptr.hbm [resolvable:$true] %s353_s4 }
  0x1e   :  { %248 = vmatpush.bf16.msra.mxu1 %v477_v5  ;;  %v499_v43 = vld [vmem:[%s713_s6] ss:$0 sm:$0xff] }
  0x1f   :  { %332 = vmatpush.bf16.msra.mxu2 %v486_v20 }
  0x21   :  { %164 = vmatpush.bf16.msra.mxu0 %v468_v6 }
  0x22   :  { %249 = vmatpush.bf16.msra.mxu1 %v476_v7 }
  0x23   :  { %333 = vmatpush.bf16.msra.mxu2 %v485_v21 }
  0x25   :  { %165 = vmatpush.bf16.msra.mxu0 %v467_v8 }
  0x26   :  { %250 = vmatpush.bf16.msra.mxu1 %v475_v15 }
  0x27   :  { %334 = vmatpush.bf16.msra.mxu2 %v484_v22 }
  0x29   :  { %166 = vmatpush.bf16.msra.mxu0 %v466_v9 }
  0x2a   :  { %251 = vmatpush.bf16.msra.mxu1 %v474_v16 }
  0x2b   :  { %335 = vmatpush.bf16.msra.mxu2 %v483_v31 }
  0x2d   :  { %167 = vmatpush.bf16.msra.mxu0 %v465_v10 }
  0x2e   :  { %252 = vmatpush.bf16.msra.mxu1 %v473_v17 }
  0x2f   :  { %336 = vmatpush.bf16.msra.mxu2 %v482_v32 }
  0x31   :  { %168 = vmatpush.bf16.msra.mxu0 %v464_v11 }
  0x32   :  { %253 = vmatpush.bf16.msra.mxu1 %v472_v18 }
  0x33   :  { %337 = vmatpush.bf16.msra.mxu2 %v481_v33 }
  0x34   :  { %169 = vmatmul.bf16.vlgmr.msra.gmra.mxu0 %v92_v14 }
  0x37   :  { %338 = vmatpush.bf16.msra.mxu2 %v480_v34 }
  0xb1   :  { %v170_v23 = vpop.f32.mrf.mxu0 }
  0xb2   :  { %v171_v25 = vadd.f32 %v497_v24, %v170_v23 }
  0xb4   :  { %v175_v28 = vmax.f32 %v171_v25, 0.0 }
  0xb9   :  { %v172_v26 = vpop.f32.mrf.mxu0 }
  0xba   :  { %v173_v27 = vadd.f32 %v497_v24, %v172_v26 }
  0xbc   :  { %v176_v29 = vmax.f32 %v173_v27, 0.0 }
  0xbe   :  { %v177_v30 = vpack.c.bf16 %v176_v29, %v175_v28 }
  0xc0   :  { %254 = vmatmul.bf16.vlgmr.msra.gmra.mxu1 %v177_v30 }
 0x13d   :  { %v255_v35 = vpop.f32.mrf.mxu1 }
 0x13e   :  { %v256_v37 = vadd.f32 %v498_v36, %v255_v35 }
 0x140   :  { %v260_v40 = vmax.f32 %v256_v37, 0.0 }
 0x145   :  { %v257_v38 = vpop.f32.mrf.mxu1 }
 0x146   :  { %v258_v39 = vadd.f32 %v498_v36, %v257_v38 }
 0x148   :  { %v261_v41 = vmax.f32 %v258_v39, 0.0 }
 0x14a   :  { %v262_v42 = vpack.c.bf16 %v261_v41, %v260_v40 }
 0x14c   :  { %339 = vmatmul.bf16.vlgmr.msra.gmra.mxu2 %v262_v42 }
 0x1cf   :  { %v340_v44 = vpop.f32.mrf.mxu2 }
 0x1d0   :  { %v341_v45 = vadd.f32 %v499_v43, %v340_v44 }
 0x1d2   :  { %345 = vst [vmem:[#allocation10] sm:$0xff] %v341_v45 }
 0x1d7   :  { %v342_v46 = vpop.f32.mrf.mxu2 }
 0x1d8   :  { %v343_v47 = vadd.f32 %v499_v43, %v342_v46 }
 0x1da   :  { %346 = vst [vmem:[#allocation10 + $0x8] sm:$0xff] %v343_v47 }
 0x1db   :  { %359 = dma.vmem_to_hbm [thread:$0]  %s352_s27, 256, %s354_s4, [#allocation4], %s632_s13, %s632_s13, %s633_s14  }
 0x1dc   :  { %626 = dma.done.wait [#allocation4], 256  }
 0x1dd   :  { %627 = vsyncadd [#allocation4], 4294967040 }
 0x1de   :  { %364 = vsyncpa [#allocation3], 1 }
 0x1df   :  { %365 = vsyncpa [#allocation6], 1 }
 0x1e0   :  { %366 = vsyncpa [#allocation9], 1 }
 0x1e1   :  { %367 = vsyncpa [#allocation4], 1 }

// kernel: tpu_custom_call.1
= control target key start
LH: loop header
LB: loop body
LE: loop exit
PB: predicated region body
PF: predicated region fallthrough
CT: control target
= control target key end

     0   :  { %12 = vsyncpa [#allocation3], 0  ;;  %s707_s0 = inlined_call_operand.hbm [shape: f32[16,128], index: 0, kind: input, shape index: {}]   ;;  %s708_s1 = inlined_call_operand.hbm [shape: bf16[128,128], index: 1, kind: input, shape index: {}]   ;;  %s709_s2 = inlined_call_operand.vmem [shape: f32[1,128], index: 2, kind: input, shape index: {}]   ;;  %s710_s3 = inlined_call_operand.hbm [shape: bf16[128,128], index: 3, kind: input, shape index: {}]   ;;  %s711_s4 = inlined_call_operand.vmem [shape: f32[1,128], index: 4, kind: input, shape index: {}]   ;;  %s712_s5 = inlined_call_operand.hbm [shape: bf16[128,128], index: 5, kind: input, shape index: {}]   ;;  %s713_s6 = inlined_call_operand.vmem [shape: f32[1,128], index: 6, kind: input, shape index: {}]   ;;  %s714_s7 = inlined_call_operand.hbm [shape: f32[16,128], index: 7, kind: output, shape index: {}]  }
   0x1   :  { %13 = vsyncpa [#allocation6], 0 }
   0x2   :  { %14 = vsyncpa [#allocation9], 0  ;;  %s33_s26 = sshll.u32 %s708_s1, 4  ;;  %s34_s26 = int_to_ptr.hbm [resolvable:$true] %s33_s26 }
   0x3   :  { %15 = vsyncpa [#allocation4], 0  ;;  %s628_s27 = smov [#allocation5]   ;;  %s20_s8 = sshll.u32 %s707_s0, 4  ;;  %s21_s8 = int_to_ptr.hbm [resolvable:$true] %s20_s8 }
   0x4   :  { %s35_s28 = sshll.u32 %s628_s27, 4  ;;  %s629_s9 = smov 64   ;;  %s36_s28 = int_to_ptr.vmem [resolvable:$true] %s35_s28 }
   0x5   :  { %s630_s10 = smov 4   ;;  %s631_s11 = smov [#allocation2]  }
   0x6   :  { %41 = dma.hbm_to_vmem [thread:$0]  %s34_s26, 1024, %s36_s28, [#allocation6], %s629_s9, %s629_s9, %s630_s10  }
   0x7   :  { %s22_s12 = sshll.u32 %s631_s11, 4  ;;  %s632_s13 = smov 128   ;;  %s23_s12 = int_to_ptr.vmem [resolvable:$true] %s22_s12 }
   0x8   :  { %s633_s14 = smov 8   ;;  %s48_s16 = sshll.u32 %s710_s3, 4  ;;  %s49_s16 = int_to_ptr.hbm [resolvable:$true] %s48_s16 }
   0x9   :  { %28 = dma.hbm_to_vmem [thread:$0]  %s21_s8, 256, %s23_s12, [#allocation3], %s632_s13, %s632_s13, %s633_s14  }
   0xa   :  { %s634_s17 = smov [#allocation7]   ;;  %s63_s20 = sshll.u32 %s712_s5, 4  ;;  %s64_s20 = int_to_ptr.hbm [resolvable:$true] %s63_s20 }
   0xb   :  { %s50_s0 = sshll.u32 %s634_s17, 4  ;;  %s635_s21 = smov [#allocation8]   ;;  %s51_s0 = int_to_ptr.vmem [resolvable:$true] %s50_s0 }
   0xc   :  { %56 = dma.hbm_to_vmem [thread:$0]  %s49_s16, 1024, %s51_s0, [#allocation6], %s629_s9, %s629_s9, %s630_s10  }
   0xd   :  { %s65_s22 = sshll.u32 %s635_s21, 4  ;;  %s66_s22 = int_to_ptr.vmem [resolvable:$true] %s65_s22 }
   0xe   :  { %71 = dma.hbm_to_vmem [thread:$0]  %s64_s20, 1024, %s66_s22, [#allocation9], %s629_s9, %s629_s9, %s630_s10  }
   0xf   :  { %620 = dma.done.wait [#allocation3], 256  }
  0x10   :  { %621 = vsyncadd [#allocation3], 4294967040 }
  0x11   :  { %622 = dma.done.wait [#allocation6], 2048  }
  0x12   :  { %623 = vsyncadd [#allocation6], 4294965248 }
  0x13   :  { %624 = dma.done.wait [#allocation9], 1024  }
  0x14   :  { %625 = vsyncadd [#allocation9], 4294966272  ;;  %v471_v0 = vld [vmem:[#allocation5 + $0x38] sm:$0xff]  ;;  %v470_v1 = vld [vmem:[#allocation5 + $0x30] sm:$0xff]  ;;  %s636_s26 = smov [#allocation10]  }
  0x15   :  { %161 = vmatpush.bf16.msra.mxu0 %v471_v0  ;;  %v479_v2 = vld [vmem:[#allocation7 + $0x38] sm:$0xff]  ;;  %v478_v3 = vld [vmem:[#allocation7 + $0x30] sm:$0xff]  ;;  %v469_v4 = vld [vmem:[#allocation5 + $0x28] sm:$0xff]  ;;  %s351_s27 = sshll.u32 %s636_s26, 4  ;;  %s352_s27 = int_to_ptr.vmem [resolvable:$true] %s351_s27 }
  0x16   :  { %246 = vmatpush.bf16.msra.mxu1 %v479_v2  ;;  %v477_v5 = vld [vmem:[#allocation7 + $0x28] sm:$0xff]  ;;  %v468_v6 = vld [vmem:[#allocation5 + $0x20] sm:$0xff]  ;;  %v467_v8 = vld [vmem:[#allocation5 + $0x18] sm:$0xff] }
  0x17   :  { %v476_v7 = vld [vmem:[#allocation7 + $0x20] sm:$0xff]  ;;  %v466_v9 = vld [vmem:[#allocation5 + $0x10] sm:$0xff]  ;;  %v465_v10 = vld [vmem:[#allocation5 + $0x8] sm:$0xff] }
  0x18   :  { %v464_v11 = vld [vmem:[#allocation5] sm:$0xff]  ;;  %v90_v12 = vld [vmem:[#allocation2] sm:$0xff]  ;;  %v91_v13 = vld [vmem:[#allocation2 + $0x8] sm:$0xff] }
  0x19   :  { %162 = vmatpush.bf16.msra.mxu0 %v470_v1  ;;  %v92_v14 = vpack.c.bf16 %v91_v13, %v90_v12  ;;  %v475_v15 = vld [vmem:[#allocation7 + $0x18] sm:$0xff]  ;;  %v474_v16 = vld [vmem:[#allocation7 + $0x10] sm:$0xff]  ;;  %v473_v17 = vld [vmem:[#allocation7 + $0x8] sm:$0xff] }
  0x1a   :  { %247 = vmatpush.bf16.msra.mxu1 %v478_v3  ;;  %v472_v18 = vld [vmem:[#allocation7] sm:$0xff]  ;;  %v487_v19 = vld [vmem:[#allocation8 + $0x38] sm:$0xff]  ;;  %v486_v20 = vld [vmem:[#allocation8 + $0x30] sm:$0xff] }
  0x1b   :  { %331 = vmatpush.bf16.msra.mxu2 %v487_v19  ;;  %v485_v21 = vld [vmem:[#allocation8 + $0x28] sm:$0xff]  ;;  %v484_v22 = vld [vmem:[#allocation8 + $0x20] sm:$0xff]  ;;  %v497_v24 = vld [vmem:[%s709_s2] ss:$0 sm:$0xff] }
  0x1c   :  { %v483_v31 = vld [vmem:[#allocation8 + $0x18] sm:$0xff]  ;;  %v482_v32 = vld [vmem:[#allocation8 + $0x10] sm:$0xff]  ;;  %v481_v33 = vld [vmem:[#allocation8 + $0x8] sm:$0xff] }
  0x1d   :  { %163 = vmatpush.bf16.msra.mxu0 %v469_v4  ;;  %v480_v34 = vld [vmem:[#allocation8] sm:$0xff]  ;;  %v498_v36 = vld [vmem:[%s711_s4] ss:$0 sm:$0xff]  ;;  %s353_s4 = sshll.u32 %s714_s7, 4  ;;  %s354_s4 = int_to_ptr.hbm [resolvable:$true] %s353_s4 }
  0x1e   :  { %248 = vmatpush.bf16.msra.mxu1 %v477_v5  ;;  %v499_v43 = vld [vmem:[%s713_s6] ss:$0 sm:$0xff] }
  0x1f   :  { %332 = vmatpush.bf16.msra.mxu2 %v486_v20 }
  0x21   :  { %164 = vmatpush.bf16.msra.mxu0 %v468_v6 }
  0x22   :  { %249 = vmatpush.bf16.msra.mxu1 %v476_v7 }
  0x23   :  { %333 = vmatpush.bf16.msra.mxu2 %v485_v21 }
  0x25   :  { %165 = vmatpush.bf16.msra.mxu0 %v467_v8 }
  0x26   :  { %250 = vmatpush.bf16.msra.mxu1 %v475_v15 }
  0x27   :  { %334 = vmatpush.bf16.msra.mxu2 %v484_v22 }
  0x29   :  { %166 = vmatpush.bf16.msra.mxu0 %v466_v9 }
  0x2a   :  { %251 = vmatpush.bf16.msra.mxu1 %v474_v16 }
  0x2b   :  { %335 = vmatpush.bf16.msra.mxu2 %v483_v31 }
  0x2d   :  { %167 = vmatpush.bf16.msra.mxu0 %v465_v10 }
  0x2e   :  { %252 = vmatpush.bf16.msra.mxu1 %v473_v17 }
  0x2f   :  { %336 = vmatpush.bf16.msra.mxu2 %v482_v32 }
  0x31   :  { %168 = vmatpush.bf16.msra.mxu0 %v464_v11 }
  0x32   :  { %253 = vmatpush.bf16.msra.mxu1 %v472_v18 }
  0x33   :  { %337 = vmatpush.bf16.msra.mxu2 %v481_v33 }
  0x34   :  { %169 = vmatmul.bf16.vlgmr.msra.gmra.mxu0 %v92_v14 }
  0x37   :  { %338 = vmatpush.bf16.msra.mxu2 %v480_v34 }
  0xb1   :  { %v170_v23 = vpop.f32.mrf.mxu0 }
  0xb2   :  { %v171_v25 = vadd.f32 %v497_v24, %v170_v23 }
  0xb4   :  { %v175_v28 = vmax.f32 %v171_v25, 0.0 }
  0xb9   :  { %v172_v26 = vpop.f32.mrf.mxu0 }
  0xba   :  { %v173_v27 = vadd.f32 %v497_v24, %v172_v26 }
  0xbc   :  { %v176_v29 = vmax.f32 %v173_v27, 0.0 }
  0xbe   :  { %v177_v30 = vpack.c.bf16 %v176_v29, %v175_v28 }
  0xc0   :  { %254 = vmatmul.bf16.vlgmr.msra.gmra.mxu1 %v177_v30 }
 0x13d   :  { %v255_v35 = vpop.f32.mrf.mxu1 }
 0x13e   :  { %v256_v37 = vadd.f32 %v498_v36, %v255_v35 }
 0x140   :  { %v260_v40 = vmax.f32 %v256_v37, 0.0 }
 0x145   :  { %v257_v38 = vpop.f32.mrf.mxu1 }
 0x146   :  { %v258_v39 = vadd.f32 %v498_v36, %v257_v38 }
 0x148   :  { %v261_v41 = vmax.f32 %v258_v39, 0.0 }
 0x14a   :  { %v262_v42 = vpack.c.bf16 %v261_v41, %v260_v40 }
 0x14c   :  { %339 = vmatmul.bf16.vlgmr.msra.gmra.mxu2 %v262_v42 }
 0x1cf   :  { %v340_v44 = vpop.f32.mrf.mxu2 }
 0x1d0   :  { %v341_v45 = vadd.f32 %v499_v43, %v340_v44 }
 0x1d2   :  { %345 = vst [vmem:[#allocation10] sm:$0xff] %v341_v45 }
 0x1d7   :  { %v342_v46 = vpop.f32.mrf.mxu2 }
 0x1d8   :  { %v343_v47 = vadd.f32 %v499_v43, %v342_v46 }
 0x1da   :  { %346 = vst [vmem:[#allocation10 + $0x8] sm:$0xff] %v343_v47 }
 0x1db   :  { %359 = dma.vmem_to_hbm [thread:$0]  %s352_s27, 256, %s354_s4, [#allocation4], %s632_s13, %s632_s13, %s633_s14  }
 0x1dc   :  { %626 = dma.done.wait [#allocation4], 256  }
 0x1dd   :  { %627 = vsyncadd [#allocation4], 4294967040 }
 0x1de   :  { %364 = vsyncpa [#allocation3], 1 }
 0x1df   :  { %365 = vsyncpa [#allocation6], 1 }
 0x1e0   :  { %366 = vsyncpa [#allocation9], 1 }
 0x1e1   :  { %367 = vsyncpa [#allocation4], 1 }

</bundles_post_ra>
